<compile_context>
chip_gen: v6e
topology: v6e:2x2x1
jax: 0.10.0
libtpu: 0.0.40
codegen_flags: <defaults>
</compile_context>

<pallas_src>
import jax
import jax.numpy as jnp
from jax.experimental import pallas as pl
from jax.experimental.pallas import tpu as pltpu

_HEAD_KEYS = ("reproduced", "diffuse_illuminations", "diffuse_reflectances",
              "residuals", "normal_bump_cams")


# ---------------------------------------------------------------------------
# Weight packing (tiny arrays; could be hoisted to init time).
# ---------------------------------------------------------------------------
def _block_diag(ws):
    """(n, o, i) -> (n*o, n*i) block-diagonal."""
    n, o, i = ws.shape
    out = jnp.zeros((n * o, n * i), ws.dtype)
    for h in range(n):
        out = out.at[h * o:(h + 1) * o, h * i:(h + 1) * i].set(ws[h])
    return out


def pack_params(params, *, compute_dtype=jnp.bfloat16, fuse_mid_layers=None):
    w1, b1, w2, b2, w3, b3, w4, b4 = params
    n_heads, c2, c = w1.shape
    c4 = w2.shape[1]
    c8 = w3.shape[1]
    if fuse_mid_layers is None:
        fuse_mid_layers = c <= 128   # block-diag FLOP waste is free only when MXU is idle

    # Layer 1: x is shared by all heads -> plain row-stack.
    w1s = w1.reshape(n_heads * c2, c).astype(compute_dtype)
    b1s = b1.reshape(n_heads * c2, 1).astype(jnp.float32)

    # Layer 4: always stacked (block-diagonal over heads), padded to 16 rows so
    # the fused output slab is sublane-dense.
    w4blk = _block_diag(w4)                                        # (15, 5*c8)
    w4blk = jnp.concatenate(
        [w4blk, jnp.zeros((1, n_heads * c8), w4blk.dtype)], axis=0)
    b4s = jnp.concatenate(
        [b4.reshape(n_heads * 3, 1), jnp.zeros((1, 1), b4.dtype)], axis=0)
    w4blk = w4blk.astype(compute_dtype)
    b4s = b4s.astype(jnp.float32)

    if fuse_mid_layers:
        w2p = _block_diag(w2).astype(compute_dtype)                # (5*c4, 5*c2)
        b2p = b2.reshape(n_heads * c4, 1).astype(jnp.float32)
        w3p = _block_diag(w3).astype(compute_dtype)                # (5*c8, 5*c4)
        b3p = b3.reshape(n_heads * c8, 1).astype(jnp.float32)
    else:
        w2p = w2.astype(compute_dtype)                             # (5, c4, c2)
        b2p = b2.astype(jnp.float32)
        w3p = w3.astype(compute_dtype)                             # (5, c8, c4)
        b3p = b3.astype(jnp.float32)

    return fuse_mid_layers, (w1s, b1s, w2p, b2p, w3p, b3p, w4blk, b4s)


# ---------------------------------------------------------------------------
# Kernels: one (batch, pixel-tile) block.  x_ref: (C, tp); o_ref: (16, tp).
# ---------------------------------------------------------------------------
def _heads_kernel_fused(x_ref, w1_ref, b1_ref, w2_ref, b2_ref, w3_ref, b3_ref,
                        w4_ref, b4_ref, o_ref):
    """All five heads fully stacked: 4 matmuls per tile (C <= 128 path)."""
    cd = w1_ref.dtype
    x = x_ref[...].astype(cd)                                           # (C, tp)
    t = jnp.maximum(
        jnp.dot(w1_ref[...], x, preferred_element_type=jnp.float32) + b1_ref[...], 0.0)
    t = jnp.maximum(
        jnp.dot(w2_ref[...], t.astype(cd), preferred_element_type=jnp.float32)
        + b2_ref[...], 0.0)
    t = jnp.maximum(
        jnp.dot(w3_ref[...], t.astype(cd), preferred_element_type=jnp.float32)
        + b3_ref[...], 0.0)
    y = jnp.dot(w4_ref[...], t.astype(cd), preferred_element_type=jnp.float32) + b4_ref[...]
    o_ref[...] = y.astype(o_ref.dtype)                                  # (16, tp)


def _heads_kernel_perhead(x_ref, w1_ref, b1_ref, w2_ref, b2_ref, w3_ref, b3_ref,
                          w4_ref, b4_ref, o_ref):
    """Large-C path: stacked layer 1, per-head layers 2-3, stacked layer 4."""
    cd = w1_ref.dtype
    c2 = w2_ref.shape[2]
    x = x_ref[...].astype(cd)                                           # (C, tp)
    t1 = jnp.maximum(
        jnp.dot(w1_ref[...], x, preferred_element_type=jnp.float32) + b1_ref[...], 0.0)
    t1 = t1.astype(cd)                                                  # (5*c2, tp)
    t3s = []
    for h in range(5):                                                  # static unroll
        th = t1[h * c2:(h + 1) * c2]
        th = jnp.maximum(
            jnp.dot(w2_ref[h], th, preferred_element_type=jnp.float32) + b2_ref[h],
            0.0).astype(cd)
        th = jnp.maximum(
            jnp.dot(w3_ref[h], th, preferred_element_type=jnp.float32) + b3_ref[h],
            0.0).astype(cd)
        t3s.append(th)
    t3 = jnp.concatenate(t3s, axis=0)                                   # (5*c8, tp)
    y = jnp.dot(w4_ref[...], t3, preferred_element_type=jnp.float32) + b4_ref[...]
    o_ref[...] = y.astype(o_ref.dtype)                                  # (16, tp)


# ---------------------------------------------------------------------------
# Wrapper: pixels tiled on lanes, no wrapper-side pad/slice of the pixel axis.
# ---------------------------------------------------------------------------
def hypersim_task_heads(x, params, *, tile_p=2048, compute_dtype=jnp.bfloat16):
    B, C, H, W = x.shape
    P = H * W
    tile_p = max(128, (int(tile_p) // 128) * 128)

    fused, packed = pack_params(params, compute_dtype=compute_dtype)
    kernel = _heads_kernel_fused if fused else _heads_kernel_perhead

    # Lane tile: whole P if it fits, else a multiple of 128 (possibly partial
    # last block -- Pallas masks the OOB output stores).
    tp = P if P <= tile_p else tile_p
    n_tiles = pl.cdiv(P, tp)
    # v7x megacore: ensure the parallel grid has >= 2 steps when possible.
    if B * n_tiles < 2 and P > 128:
        tp = max(128, (((P + 1) // 2 + 127) // 128) * 128)
        n_tiles = pl.cdiv(P, tp)
    grid = (B, n_tiles)

    xf = x.reshape(B, C, P)                       # NCHW kept; free reshape

    def inv_spec(a):                              # grid-invariant (DMA'd once)
        nd = a.ndim
        return pl.BlockSpec(a.shape, lambda b, p, _nd=nd: (0,) * _nd)

    out = pl.pallas_call(
        kernel,
        out_shape=jax.ShapeDtypeStruct((B, 16, P), x.dtype),
        grid_spec=pltpu.PrefetchScalarGridSpec(
            num_scalar_prefetch=0,
            grid=grid,
            in_specs=[pl.BlockSpec((None, C, tp), lambda b, p: (b, 0, p))]
                     + [inv_spec(a) for a in packed],
            out_specs=pl.BlockSpec((None, 16, tp), lambda b, p: (b, 0, p)),
        ),
        compiler_params=pltpu.CompilerParams(
            dimension_semantics=("parallel", "parallel"),
            # v5e/v6e: raise further when sweeping tile_p to 4k-8k;
            # v7x: keep <= 64 MiB (physical VMEM is halved vs v6e).
            vmem_limit_bytes=64 * 1024 * 1024,
        ),
    )(xf, *packed)

    out = out.reshape(B, 16, H, W)                # rows 0..14 = heads, 15 = pad
    return {k: out[:, 3 * h:3 * h + 3] for h, k in enumerate(_HEAD_KEYS)}


# ---------------------------------------------------------------------------
# Deterministic parameter init (5 heads, identical architecture)
# ---------------------------------------------------------------------------
def init_params(key, n_features_in):
    c, c2, c4, c8 = (n_features_in, n_features_in // 2,
                     n_features_in // 4, n_features_in // 8)
    ks = jax.random.split(key, 8)

    def w(k, shape, fan_in):
        return jax.random.normal(k, shape, jnp.float32) / jnp.sqrt(fan_in)

    w1 = w(ks[0], (5, c2, c), c)
    b1 = 0.01 * jax.random.normal(ks[1], (5, c2, 1), jnp.float32)
    w2 = w(ks[2], (5, c4, c2), c2)
    b2 = 0.01 * jax.random.normal(ks[3], (5, c4, 1), jnp.float32)
    w3 = w(ks[4], (5, c8, c4), c4)
    b3 = 0.01 * jax.random.normal(ks[5], (5, c8, 1), jnp.float32)
    w4 = w(ks[6], (5, 3, c8), c8)
    b4 = 0.01 * jax.random.normal(ks[7], (5, 3, 1), jnp.float32)
    return (w1, b1, w2, b2, w3, b3, w4, b4)


# ---------------------------------------------------------------------------
# Pure-JAX reference (same math, no Pallas)
# ---------------------------------------------------------------------------
def reference(x, params):
    B, C, H, W = x.shape
    w1, b1, w2, b2, w3, b3, w4, b4 = params
    xf = x.reshape(B, C, H * W)
    outs = {}
    for h, k in enumerate(_HEAD_KEYS):
        t = jnp.maximum(jnp.einsum('oc,bcp->bop', w1[h], xf,
                                   precision='highest') + b1[h][None], 0.0)
        t = jnp.maximum(jnp.einsum('oc,bcp->bop', w2[h], t,
                                   precision='highest') + b2[h][None], 0.0)
        t = jnp.maximum(jnp.einsum('oc,bcp->bop', w3[h], t,
                                   precision='highest') + b3[h][None], 0.0)
        y = jnp.einsum('oc,bcp->bop', w4[h], t, precision='highest') + b4[h][None]
        outs[k] = y.reshape(B, 3, H, W)
    return outs


if __name__ == "__main__":
    key = jax.random.PRNGKey(0)

    def check(out, ref, atol, rtol, tag):
        for k in _HEAD_KEYS:
            assert out[k].shape == ref[k].shape, (tag, k, out[k].shape, ref[k].shape)
            o = out[k].astype(jnp.float32)
            err = float(jnp.max(jnp.abs(o - ref[k])))
            assert jnp.allclose(o, ref[k], atol=atol, rtol=rtol), (tag, k, err)

    # 1) Small C (fully fused block-diagonal path), f32 compute, divisible P.
    B, C, H, W = 2, 32, 16, 16
    kx, kp = jax.random.split(key)
    x = jax.random.normal(kx, (B, C, H, W), jnp.float32)
    params = init_params(kp, C)
    ref = reference(x, params)

    out = hypersim_task_heads(x, params, compute_dtype=jnp.float32)
    out = jax.tree_util.tree_map(jax.block_until_ready, out)
    check(out, ref, 1e-3, 1e-3, "f32")

    # 2) bf16 operands (default compute dtype), f32 accumulation, looser tol.
    out_bf16 = hypersim_task_heads(x, params)
    out_bf16 = jax.tree_util.tree_map(jax.block_until_ready, out_bf16)
    check(out_bf16, ref, 1e-1, 1e-1, "bf16")

    # 3) Ragged P: partial last pixel block (masked stores / padded tail reads).
    Hr, Wr = 10, 13
    xr = jax.random.normal(jax.random.PRNGKey(1), (B, C, Hr, Wr), jnp.float32)
    out_r = hypersim_task_heads(xr, params, tile_p=128, compute_dtype=jnp.float32)
    out_r = jax.tree_util.tree_map(jax.block_until_ready, out_r)
    check(out_r, reference(xr, params), 1e-3, 1e-3, "ragged")

    # 4) Large C (per-head middle layers, stacked last layer), B=1 grid split.
    C2 = 256
    x2 = jax.random.normal(jax.random.PRNGKey(2), (1, C2, 16, 16), jnp.float32)
    params2 = init_params(jax.random.PRNGKey(3), C2)
    out2 = hypersim_task_heads(x2, params2, compute_dtype=jnp.float32)
    out2 = jax.tree_util.tree_map(jax.block_until_ready, out2)
    check(out2, reference(x2, params2), 1e-3, 1e-3, "largeC")

    print("KERNEL_OK")
</pallas_src>

<mosaic_0001>
module attributes {stable_mosaic.version = 11 : i64} {
  func.func @_heads_kernel_fused(%arg0: i32, %arg1: i32, %arg2: memref<1x32x256xf32, #tpu.memory_space<vmem>>, %arg3: memref<80x32xf32, #tpu.memory_space<vmem>>, %arg4: memref<80x1xf32, #tpu.memory_space<vmem>>, %arg5: memref<40x80xf32, #tpu.memory_space<vmem>>, %arg6: memref<40x1xf32, #tpu.memory_space<vmem>>, %arg7: memref<20x40xf32, #tpu.memory_space<vmem>>, %arg8: memref<20x1xf32, #tpu.memory_space<vmem>>, %arg9: memref<16x20xf32, #tpu.memory_space<vmem>>, %arg10: memref<16x1xf32, #tpu.memory_space<vmem>>, %arg11: memref<1x16x256xf32, #tpu.memory_space<vmem>>) attributes {dimension_semantics = [#tpu.dimension_semantics<parallel>, #tpu.dimension_semantics<parallel>], iteration_bounds = array<i64: 2, 1>, scalar_prefetch = 0 : i64, scratch_operands = 0 : i64, tpu.core_type = #tpu.core_type<tc>, window_params = [{transform_indices = @transform_0, window_bounds = array<i64: 1, 32, 256>}, {pipeline_mode = #tpu.pipeline_mode<synchronous>, transform_indices = @transform_1, window_bounds = array<i64: 80, 32>}, {pipeline_mode = #tpu.pipeline_mode<synchronous>, transform_indices = @transform_2, window_bounds = array<i64: 80, 1>}, {pipeline_mode = #tpu.pipeline_mode<synchronous>, transform_indices = @transform_3, window_bounds = array<i64: 40, 80>}, {pipeline_mode = #tpu.pipeline_mode<synchronous>, transform_indices = @transform_4, window_bounds = array<i64: 40, 1>}, {pipeline_mode = #tpu.pipeline_mode<synchronous>, transform_indices = @transform_5, window_bounds = array<i64: 20, 40>}, {pipeline_mode = #tpu.pipeline_mode<synchronous>, transform_indices = @transform_6, window_bounds = array<i64: 20, 1>}, {pipeline_mode = #tpu.pipeline_mode<synchronous>, transform_indices = @transform_7, window_bounds = array<i64: 16, 20>}, {pipeline_mode = #tpu.pipeline_mode<synchronous>, transform_indices = @transform_8, window_bounds = array<i64: 16, 1>}, {transform_indices = @transform_9, window_bounds = array<i64: 1, 16, 256>}]} {
    %c0 = arith.constant 0 : index
    %c0_0 = arith.constant 0 : index
    %c0_1 = arith.constant 0 : index
    %0 = vector.load %arg2[%c0, %c0_0, %c0_1] : memref<1x32x256xf32, #tpu.memory_space<vmem>>, vector<1x32x256xf32>
    %1 = vector.shape_cast %0 : vector<1x32x256xf32> to vector<32x256xf32>
    %c0_2 = arith.constant 0 : index
    %c0_3 = arith.constant 0 : index
    %2 = vector.load %arg3[%c0_2, %c0_3] : memref<80x32xf32, #tpu.memory_space<vmem>>, vector<80x32xf32>
    %cst = arith.constant dense<0.000000e+00> : vector<80x256xf32>
    %3 = tpu.matmul %2, %1, %cst {dimension_numbers = #tpu.dot_dimension_numbers<[1], [0], [0], [1], [0, 0, 1, 1], [], []>} : vector<80x32xf32>, vector<32x256xf32>, vector<80x256xf32> -> vector<80x256xf32>
    %c0_4 = arith.constant 0 : index
    %c0_5 = arith.constant 0 : index
    %4 = vector.load %arg4[%c0_4, %c0_5] : memref<80x1xf32, #tpu.memory_space<vmem>>, vector<80x1xf32>
    %5 = vector.broadcast %4 : vector<80x1xf32> to vector<80x256xf32>
    %6 = arith.addf %3, %5 : vector<80x256xf32>
    %cst_6 = arith.constant 0.000000e+00 : f32
    %7 = vector.broadcast %cst_6 : f32 to vector<80x256xf32>
    %8 = arith.maximumf %6, %7 : vector<80x256xf32>
    %c0_7 = arith.constant 0 : index
    %c0_8 = arith.constant 0 : index
    %9 = vector.load %arg5[%c0_7, %c0_8] : memref<40x80xf32, #tpu.memory_space<vmem>>, vector<40x80xf32>
    %cst_9 = arith.constant dense<0.000000e+00> : vector<40x256xf32>
    %10 = tpu.matmul %9, %8, %cst_9 {dimension_numbers = #tpu.dot_dimension_numbers<[1], [0], [0], [1], [0, 0, 1, 1], [], []>} : vector<40x80xf32>, vector<80x256xf32>, vector<40x256xf32> -> vector<40x256xf32>
    %c0_10 = arith.constant 0 : index
    %c0_11 = arith.constant 0 : index
    %11 = vector.load %arg6[%c0_10, %c0_11] : memref<40x1xf32, #tpu.memory_space<vmem>>, vector<40x1xf32>
    %12 = vector.broadcast %11 : vector<40x1xf32> to vector<40x256xf32>
    %13 = arith.addf %10, %12 : vector<40x256xf32>
    %cst_12 = arith.constant 0.000000e+00 : f32
    %14 = vector.broadcast %cst_12 : f32 to vector<40x256xf32>
    %15 = arith.maximumf %13, %14 : vector<40x256xf32>
    %c0_13 = arith.constant 0 : index
    %c0_14 = arith.constant 0 : index
    %16 = vector.load %arg7[%c0_13, %c0_14] : memref<20x40xf32, #tpu.memory_space<vmem>>, vector<20x40xf32>
    %cst_15 = arith.constant dense<0.000000e+00> : vector<20x256xf32>
    %17 = tpu.matmul %16, %15, %cst_15 {dimension_numbers = #tpu.dot_dimension_numbers<[1], [0], [0], [1], [0, 0, 1, 1], [], []>} : vector<20x40xf32>, vector<40x256xf32>, vector<20x256xf32> -> vector<20x256xf32>
    %c0_16 = arith.constant 0 : index
    %c0_17 = arith.constant 0 : index
    %18 = vector.load %arg8[%c0_16, %c0_17] : memref<20x1xf32, #tpu.memory_space<vmem>>, vector<20x1xf32>
    %19 = vector.broadcast %18 : vector<20x1xf32> to vector<20x256xf32>
    %20 = arith.addf %17, %19 : vector<20x256xf32>
    %cst_18 = arith.constant 0.000000e+00 : f32
    %21 = vector.broadcast %cst_18 : f32 to vector<20x256xf32>
    %22 = arith.maximumf %20, %21 : vector<20x256xf32>
    %c0_19 = arith.constant 0 : index
    %c0_20 = arith.constant 0 : index
    %23 = vector.load %arg9[%c0_19, %c0_20] : memref<16x20xf32, #tpu.memory_space<vmem>>, vector<16x20xf32>
    %cst_21 = arith.constant dense<0.000000e+00> : vector<16x256xf32>
    %24 = tpu.matmul %23, %22, %cst_21 {dimension_numbers = #tpu.dot_dimension_numbers<[1], [0], [0], [1], [0, 0, 1, 1], [], []>} : vector<16x20xf32>, vector<20x256xf32>, vector<16x256xf32> -> vector<16x256xf32>
    %c0_22 = arith.constant 0 : index
    %c0_23 = arith.constant 0 : index
    %25 = vector.load %arg10[%c0_22, %c0_23] : memref<16x1xf32, #tpu.memory_space<vmem>>, vector<16x1xf32>
    %26 = vector.broadcast %25 : vector<16x1xf32> to vector<16x256xf32>
    %27 = arith.addf %24, %26 : vector<16x256xf32>
    %c0_24 = arith.constant 0 : index
    %c0_25 = arith.constant 0 : index
    %c0_26 = arith.constant 0 : index
    %28 = vector.load %arg11[%c0_24, %c0_25, %c0_26] : memref<1x16x256xf32, #tpu.memory_space<vmem>>, vector<1x16x256xf32>
    %29 = vector.shape_cast %28 : vector<1x16x256xf32> to vector<16x256xf32>
    %30 = vector.shape_cast %27 : vector<16x256xf32> to vector<1x16x256xf32>
    tpu.vector_store %arg11[%c0_24, %c0_25, %c0_26], %30 {strides = array<i32>} : memref<1x16x256xf32, #tpu.memory_space<vmem>>, vector<1x16x256xf32>,
    return
  }
  func.func @transform_0(%arg0: i32, %arg1: i32) -> (i32, i32, i32) {
    %c0_i32 = arith.constant 0 : i32
    %c0_i32_0 = arith.constant 0 : i32
    return %arg0, %c0_i32, %arg1 : i32, i32, i32
  }
  func.func @transform_1(%arg0: i32, %arg1: i32) -> (i32, i32) {
    %c0_i32 = arith.constant 0 : i32
    %c0_i32_0 = arith.constant 0 : i32
    %c0_i32_1 = arith.constant 0 : i32
    return %c0_i32, %c0_i32_0 : i32, i32
  }
  func.func @transform_2(%arg0: i32, %arg1: i32) -> (i32, i32) {
    %c0_i32 = arith.constant 0 : i32
    %c0_i32_0 = arith.constant 0 : i32
    %c0_i32_1 = arith.constant 0 : i32
    return %c0_i32, %c0_i32_0 : i32, i32
  }
  func.func @transform_3(%arg0: i32, %arg1: i32) -> (i32, i32) {
    %c0_i32 = arith.constant 0 : i32
    %c0_i32_0 = arith.constant 0 : i32
    %c0_i32_1 = arith.constant 0 : i32
    return %c0_i32, %c0_i32_0 : i32, i32
  }
  func.func @transform_4(%arg0: i32, %arg1: i32) -> (i32, i32) {
    %c0_i32 = arith.constant 0 : i32
    %c0_i32_0 = arith.constant 0 : i32
    %c0_i32_1 = arith.constant 0 : i32
    return %c0_i32, %c0_i32_0 : i32, i32
  }
  func.func @transform_5(%arg0: i32, %arg1: i32) -> (i32, i32) {
    %c0_i32 = arith.constant 0 : i32
    %c0_i32_0 = arith.constant 0 : i32
    %c0_i32_1 = arith.constant 0 : i32
    return %c0_i32, %c0_i32_0 : i32, i32
  }
  func.func @transform_6(%arg0: i32, %arg1: i32) -> (i32, i32) {
    %c0_i32 = arith.constant 0 : i32
    %c0_i32_0 = arith.constant 0 : i32
    %c0_i32_1 = arith.constant 0 : i32
    return %c0_i32, %c0_i32_0 : i32, i32
  }
  func.func @transform_7(%arg0: i32, %arg1: i32) -> (i32, i32) {
    %c0_i32 = arith.constant 0 : i32
    %c0_i32_0 = arith.constant 0 : i32
    %c0_i32_1 = arith.constant 0 : i32
    return %c0_i32, %c0_i32_0 : i32, i32
  }
  func.func @transform_8(%arg0: i32, %arg1: i32) -> (i32, i32) {
    %c0_i32 = arith.constant 0 : i32
    %c0_i32_0 = arith.constant 0 : i32
    %c0_i32_1 = arith.constant 0 : i32
    return %c0_i32, %c0_i32_0 : i32, i32
  }
  func.func @transform_9(%arg0: i32, %arg1: i32) -> (i32, i32, i32) {
    %c0_i32 = arith.constant 0 : i32
    %c0_i32_0 = arith.constant 0 : i32
    return %arg0, %c0_i32, %arg1 : i32, i32, i32
  }
}

</mosaic_0001>

<bundles_post_ra>
// kernel: tpu_custom_call.1
= control target key start
LH: loop header
LB: loop body
LE: loop exit
PB: predicated region body
PF: predicated region fallthrough
CT: control target
= control target key end

     0   :  { %14 = vsyncpa [#allocation3], 0  ;;  %s1603_s0 = inlined_call_operand.vmem [shape: f32[2,32,256], index: 0, kind: input, shape index: {}]   ;;  %s1604_s1 = inlined_call_operand.vmem [shape: f32[80,32], index: 1, kind: input, shape index: {}]   ;;  %s1605_s2 = inlined_call_operand.vmem [shape: f32[80,1], index: 2, kind: input, shape index: {}]   ;;  %s1606_s3 = inlined_call_operand.vmem [shape: f32[40,80], index: 3, kind: input, shape index: {}]   ;;  %s1607_s4 = inlined_call_operand.vmem [shape: f32[40,1], index: 4, kind: input, shape index: {}]   ;;  %s1608_s5 = inlined_call_operand.vmem [shape: f32[20,40], index: 5, kind: input, shape index: {}]   ;;  %s1609_s6 = inlined_call_operand.vmem [shape: f32[20,1], index: 6, kind: input, shape index: {}]   ;;  %s1610_s7 = inlined_call_operand.vmem [shape: f32[16,20], index: 7, kind: input, shape index: {}]   ;;  %s1611_s8 = inlined_call_operand.vmem [shape: f32[16,1], index: 8, kind: input, shape index: {}]   ;;  %s1612_s9 = inlined_call_operand.hbm [shape: f32[2,16,256], index: 9, kind: output, shape index: {}]  }
   0x1   :  { %16 = vsyncpa [#allocation3 + $0x1], 0  ;;  %s1327_s30 = smov 0   ;;  %s1329_s10 = smov 0  }
   0x2   :  { %s1331_s11 = smov 0   ;;  %s1333_s12 = smov 0  }
   0x3   :  { %s1335_s13 = smov 0   ;;  %s1337_s14 = smov 0  }
   0x4 LB: > { %1615 = sst [smem:[#allocation5_spill]] %s1266_s13  ;;  %s1096_s15 = sadd.s32 4294967295, %s1270_s14   ;;  %s1270_s14 = sphi %s1337_s14, %s22_s14   ;;  %s1266_s13 = sphi %s1335_s13, %s1620_s13   ;;  %s1262_s12 = sphi %s1333_s12, %s1619_s12   ;;  %s1258_s11 = sphi %s1331_s11, %s1623_s11   ;;  %s1254_s10 = sphi %s1329_s10, %s1622_s10   ;;  %s1250_s30 = sphi %s1327_s30, %s1621_s30  }
   0x5   : > { %s1097_s16 = sadd.s32 4294967294, %s1270_s14   ;;  %s34_s17 = sadd.s32 1, %s1266_s13 }
   0x6   : > { %s239_s18 = sadd.s32 1, %s1258_s11  ;;  %p36_p0 = scmp.ge.s32.totalorder %s34_s17, 2 }
   0x7   : > { %p249_p1 = scmp.ne.s32.totalorder %s1258_s11, %s1254_s10  ;;  %p250_p2 = scmp.eq.s32.totalorder %s1096_s15, 1 }
   0x8   : > { %p255_p3 = scmp.ne.s32.totalorder %s1254_s10, %s1250_s30  ;;  %s1625_s17 = smov (%p36_p0, %s34_s17), 0 }
   0x9   : > { %1616 = sst [smem:[#allocation6_spill]] %s1625_s17  ;;  %p1367_p4 = por %p250_p2, %p249_p1 }
   0xa   : > { %p256_p5 = scmp.eq.s32.totalorder %s1097_s16, 1  ;;  %s234_s20 = ssub.s32 %s1266_s13, %s1625_s17 }
   0xb   : > { %p1100_p6 = scmp.ge.s32.totalorder %s1270_s14, 1  ;;  %p237_p7 = scmp.eq.s32.totalorder %s234_s20, 0 }
   0xc   : > { %p1374_p8 = por %p256_p5, %p255_p3  ;;  %p311_p9 = scmp.lt.s32.totalorder %s1270_s14, 3 }
   0xd   : > { %s1380_s22 = scalar_select %p237_p7, %s1258_s11, %s239_s18  }
   0xe   : > { %p312_p10 = pnand %p1100_p6, %p311_p9 }
   0xf   : > { %p352_p11 = scmp.lt.s32.totalorder (!%p312_p10), %s1262_s12, 1  ;;  %s1132_s18 = sshll.u32 (!%p312_p10), %s1262_s12, 9 }
  0x10   : > { %315 = sbr.rel (%p312_p10) target bundleno = 942 (0x3ae), region = 56  ;;  %s1556_s24 = scalar_lea.hbm (!%p312_p10), %s1612_s9, %s1132_s18 }
  0x11   : > { %s1274_s13 = smov (!%p312_p10), [#allocation2]  }
  0x12   : > { %s1198_s17 = sshll.u32 (!%p312_p10), %s1274_s13, 4  ;;  %s1199_s17 = int_to_ptr.vmem [resolvable:$false] %s1198_s17 }
  0x13   : > { %s1200_s26 = scalar_lea.vmem (!%p312_p10), %s1199_s17, 1024 }
  0x15   : > { %v1272_v0 = vmov 0.0   ;;  %s353_s23 = scalar_select %p352_p11, %s1262_s12, 1  ;;  %v1273_v1 = vmov 0   ;;  %v387_v2 = vld [vmem:[%s1605_s2 + $0x38] sm:$0xff]  ;;  %v389_v3 = vld [vmem:[%s1605_s2 + $0x48] sm:$0xff]  ;;  %v386_v4 = vld [vmem:[%s1605_s2 + $0x30] sm:$0xff] }
  0x16   : > { %535 = vmatprep.mubr.f32.mxu0 %v1272_v0  ;;  %731 = vmatprep.mubr.f32.mxu1 %v1272_v0  ;;  %v388_v5 = vld [vmem:[%s1605_s2 + $0x40] sm:$0xff]  ;;  %v385_v14 = vld [vmem:[%s1605_s2 + $0x28] sm:$0xff]  ;;  %vm440_vm0 = vcmask 261120   ;;  %v382_v17 = vld [vmem:[%s1605_s2 + $0x10] sm:$0xff]  ;;  %vm651_vm1 = vcmask 654336   ;;  %vm793_vm2 = vcmask 326656  }
  0x17   : > { %1193 = vset.pattern.permute.xlu1 %v1273_v1  ;;  %1192 = vset.pattern.permute.xlu0 %v1273_v1  ;;  %s1131_s28 = sshll.u32 %s353_s23, 6  ;;  %v384_v12 = vld [vmem:[%s1605_s2 + $0x20] sm:$0xff]  ;;  %v383_v18 = vld [vmem:[%s1605_s2 + $0x18] sm:$0xff]  ;;  %v371_v19 = vld [vmem:[%s1604_s1 + $0x8] sm:$0xff]  ;;  %vm913_vm3 = vcmask 1043456   ;;  %vm906_vm4 = vcmask 162816  }
  0x18   : > { %427 = vperm.xlu1 %1193, %v387_v2   ;;  %437 = vperm.xlu0 %1192, %v389_v3   ;;  %s359_s16 = scalar_lea.vmem %s1603_s0, %s1131_s28  ;;  %v370_v16 = vld [vmem:[%s1604_s1] sm:$0xff]  ;;  %v381_v21 = vld [vmem:[%s1605_s2 + $0x8] sm:$0xff]  ;;  %v372_v22 = vld [vmem:[%s1604_s1 + $0x10] sm:$0xff]  ;;  %s348_s28 = sand.u32 1, %s1254_s10  }
  0x19   : > { %v369_v6 = vld [vmem:[%s359_s16 + $0x38] sm:$0xff]  ;;  %v368_v7 = vld [vmem:[%s359_s16 + $0x30] sm:$0xff]  ;;  %v367_v8 = vld [vmem:[%s359_s16 + $0x28] sm:$0xff]  ;;  %s1101_s29 = sshll.u32 %s348_s28, 5  ;;  %s1558_s25 = scalar_lea.sflag [#allocation3], %s348_s28 }
  0x1a   : > { %495 = vmatprep.subr.mxu0 %v369_v6  ;;  %v366_v9 = vld [vmem:[%s359_s16 + $0x20] sm:$0xff]  ;;  %v365_v10 = vld [vmem:[%s359_s16 + $0x18] sm:$0xff]  ;;  %v364_v11 = vld [vmem:[%s359_s16 + $0x10] sm:$0xff]  ;;  %s350_s15 = scalar_lea.vmem [#allocation2], %s1101_s29 }
  0x1b   : > { %496 = vmatpush1.msra.mxu0 %v368_v7  ;;  %v363_v13 = vld [vmem:[%s359_s16 + $0x8] sm:$0xff]  ;;  %v362_v15 = vld [vmem:[%s359_s16] sm:$0xff]  ;;  %v624_v23 = vld [vmem:[%s1607_s4 + $0x18] sm:$0xff]  ;;  %s1017_s16 = sshll.u32 %s350_s15, 4  ;;  %s1551_s16 = int_to_ptr.vmem [resolvable:$true] %s1017_s16 }
  0x1c   : > { %422 = vperm.xlu1 %1193, %v386_v4   ;;  %497 = vmatprep.subr.mxu0 %v367_v8  ;;  %v380_v20 = vld [vmem:[%s1605_s2] sm:$0xff]  ;;  %v373_v25 = vld [vmem:[%s1604_s1 + $0x18] sm:$0xff]  ;;  %v622_v26 = vld [vmem:[%s1607_s4 + $0x8] sm:$0xff]  ;;  %s1194_s12 = scalar_lea.vmem %s1551_s16, 512  ;;  %p1201_p1 = scmp.lt.s32.totalorder %s1551_s16, %s1199_s17 }
  0x1d   : > { %432 = vperm.xlu0 %1192, %v388_v5   ;;  %498 = vmatpush1.msra.mxu0 %v366_v9  ;;  %v625_v24 = vld [vmem:[%s1607_s4 + $0x20] sm:$0xff]  ;;  %v623_v27 = vld [vmem:[%s1607_s4 + $0x10] sm:$0xff]  ;;  %v375_v31 = vld [vmem:[%s1604_s1 + $0x28] sm:$0xff]  ;;  %p1195_p12 = scmp.ne.s32.totalorder %s1551_s16, %s1194_s12  ;;  %p1202_p2 = scmp.lt.s32.totalorder %s1200_s26, %s1194_s12 }
  0x1e   : > { %499 = vmatprep.subr.mxu0 %v365_v10  ;;  %v374_v28 = vld [vmem:[%s1604_s1 + $0x20] sm:$0xff]  ;;  %v777_v29 = vld [vmem:[%s1609_s6 + $0x10] sm:$0xf]  ;;  %v776_v33 = vld [vmem:[%s1609_s6 + $0x8] sm:$0xff] }
  0x1f   : > { %500 = vmatpush1.msra.mxu0 %v364_v11  ;;  %v621_v30 = vld [vmem:[%s1607_s4] sm:$0xff]  ;;  %v376_v34 = vld [vmem:[%s1604_s1 + $0x30] sm:$0xff]  ;;  %v895_v35 = vld [vmem:[%s1611_s8 + $0x8] sm:$0xff]  ;;  %p1196_p13 = pnand %p1195_p12, %p1367_p4  ;;  %p1203_p3 = por %p1202_p2, %p1201_p1 }
  0x20   : > { %412 = vperm.xlu1 %1193, %v384_v12   ;;  %501 = vmatprep.subr.mxu0 %v363_v13  ;;  %v775_v32 = vld [vmem:[%s1609_s6] sm:$0xff]  ;;  %v377_v37 = vld [vmem:[%s1604_s1 + $0x38] sm:$0xff]  ;;  %v379_v39 = vld [vmem:[%s1604_s1 + $0x48] sm:$0xff] }
  0x21   : > { %417 = vperm.xlu0 %1192, %v385_v14   ;;  %502 = vmatpush1.msra.mxu0 %v362_v15  ;;  %v894_v36 = vld [vmem:[%s1611_s8] sm:$0xff]  ;;  %p1197_p0 = pneg %p1196_p13 }
  0x22   : > { %1104 = vmatmul.mubr.msk.f32.vlgmr.msra.gmra.mxu0 %vm440_vm0, %v370_v16  ;;  %v378_v38 = vld [vmem:[%s1604_s1 + $0x40] sm:$0xff] }
  0x23   : > { %541 = vmatprep.mubr.f32.mxu0 %v1272_v0  ;;  %p1204_p5 = pnand %p1203_p3, %p1197_p0 }
  0x24   : > { %402 = vperm.xlu1 %1193, %v382_v17  }
  0x25   : > { %407 = vperm.xlu0 %1192, %v383_v18  }
  0x26   : > { %1105 = vmatmul.mubr.msk.f32.gmra.mxu0 %vm440_vm0, %v371_v19 }
  0x27   : > { %547 = vmatprep.mubr.f32.mxu0 %v1272_v0 }
  0x28   : > { %392 = vperm.xlu1 %1193, %v380_v20  }
  0x29   : > { %397 = vperm.xlu0 %1192, %v381_v21  }
  0x2a   : > { %1106 = vmatmul.mubr.msk.f32.gmra.mxu0 %vm440_vm0, %v372_v22 }
  0x2b   : > { %553 = vmatprep.mubr.f32.mxu0 %v1272_v0 }
  0x2c   : > { %643 = vperm.xlu1 %1193, %v624_v23  }
  0x2d   : > { %648 = vperm.xlu0 %1192, %v625_v24  }
  0x2e   : > { %1107 = vmatmul.mubr.msk.f32.gmra.mxu0 %vm440_vm0, %v373_v25 }
  0x2f   : > { %559 = vmatprep.mubr.f32.mxu0 %v1272_v0 }
  0x30   : > { %633 = vperm.xlu1 %1193, %v622_v26  }
  0x31   : > { %638 = vperm.xlu0 %1192, %v623_v27  }
  0x32   : > { %1108 = vmatmul.mubr.msk.f32.gmra.mxu0 %vm440_vm0, %v374_v28 }
  0x33   : > { %565 = vmatprep.mubr.f32.mxu0 %v1272_v0 }
  0x34   : > { %790 = vperm.xlu1 %1193, %v777_v29  }
  0x35   : > { %628 = vperm.xlu0 %1192, %v621_v30  }
  0x36   : > { %1109 = vmatmul.mubr.msk.f32.gmra.mxu0 %vm440_vm0, %v375_v31 }
  0x37   : > { %571 = vmatprep.mubr.f32.mxu0 %v1272_v0 }
  0x38   : > { %780 = vperm.xlu1 %1193, %v775_v32  }
  0x39   : > { %785 = vperm.xlu0 %1192, %v776_v33  }
  0x3a   : > { %1110 = vmatmul.mubr.msk.f32.gmra.mxu0 %vm440_vm0, %v376_v34 }
  0x3b   : > { %577 = vmatprep.mubr.f32.mxu0 %v1272_v0 }
  0x3c   : > { %903 = vperm.xlu1 %1193, %v895_v35  }
  0x3d   : > { %898 = vperm.xlu0 %1192, %v894_v36  }
  0x3e   : > { %1111 = vmatmul.mubr.msk.f32.gmra.mxu0 %vm440_vm0, %v377_v37 }
  0x3f   : > { %583 = vmatprep.mubr.f32.mxu0 %v1272_v0 }
  0x42   : > { %1112 = vmatmul.mubr.msk.f32.gmra.mxu0 %vm440_vm0, %v378_v38 }
  0x43   : > { %589 = vmatprep.mubr.f32.mxu0 %v1272_v0 }
  0x46   : > { %1113 = vmatmul.mubr.msk.f32.gmra.mxu0 %vm440_vm0, %v379_v39 }
  0x47   : > { %984 = vmatprep.mubr.f32.mxu0 %v1272_v0 }
  0x93   : > { %v438_v54 = vpop.permute.xlu0 %437  ;;  %v428_v56 = vpop.permute.xlu1 %427 }
  0x97   : > { %v423_v61 = vpop.permute.xlu1 %422 }
  0x98   : > { %v433_v59 = vpop.permute.xlu0 %432 }
  0x9b   : > { %v413_v6 = vpop.permute.xlu1 %412 }
  0x9c   : > { %v418_v2 = vpop.permute.xlu0 %417 }
  0x9f   : > { %v403_v20 = vpop.permute.xlu1 %402 }
  0xa0   : > { %v408_v15 = vpop.permute.xlu0 %407 }
  0xa3   : > { %v393_v34 = vpop.permute.xlu1 %392 }
  0xa4   : > { %v398_v29 = vpop.permute.xlu0 %397 }
  0xe2   : > { %v1499_v40 = vpop.f32.mrf.mxu0 }
  0xe4   : > { %v1501_v41 = vpop.f32.mrf.mxu0 }
  0xe5   : > { %v540_v39 = vadd.f32 %v1501_v41, %v393_v34  ;;  %v618_v41 = vld [vmem:[%s1606_s3 + $0x10] sm:$0xff] }
  0xe6   : > { %v1503_v42 = vpop.f32.mrf.mxu0 }
  0xe7   : > { %v544_v37 = vadd.f32 %v1503_v42, %v398_v29  ;;  %v616_v42 = vld [vmem:[%s1606_s3] sm:$0xff] }
  0xe8   : > { %v1505_v43 = vpop.f32.mrf.mxu0 }
  0xe9   : > { %v546_v35 = vadd.f32 %v1505_v43, %v398_v29 }
  0xea   : > { %v549_v44 = vpop.f32.mrf.mxu0 }
  0xeb   : > { %v550_v32 = vadd.f32 %v549_v44, %v403_v20  ;;  %v599_v44 = vmax.f32 %v546_v35, 0.0 }
  0xec   : > { %v551_v45 = vpop.f32.mrf.mxu0 }
  0xed   : > { %v552_v30 = vadd.f32 %v551_v45, %v403_v20  ;;  %v538_v45 = vadd.f32 %v1499_v40, %v393_v34  ;;  %v617_v40 = vld [vmem:[%s1606_s3 + $0x8] sm:$0xff] }
  0xee   : > { %v555_v46 = vpop.f32.mrf.mxu0 }
  0xef   : > { %v556_v27 = vadd.f32 %v555_v46, %v408_v15  ;;  %v601_v46 = vmax.f32 %v552_v30, 0.0  ;;  %v596_v43 = vmax.f32 %v538_v45, 0.0 }
  0xf0   : > { %v557_v47 = vpop.f32.mrf.mxu0 }
  0xf1   : > { %v558_v25 = vadd.f32 %v557_v47, %v408_v15  ;;  %v602_v38 = vmax.f32 %v556_v27, 0.0  ;;  %v600_v47 = vmax.f32 %v550_v32, 0.0 }
  0xf2   : > { %v561_v48 = vpop.f32.mrf.mxu0 }
  0xf3   : > { %v562_v23 = vadd.f32 %v561_v48, %v413_v6  ;;  %v603_v36 = vmax.f32 %v558_v25, 0.0  ;;  %v598_v48 = vmax.f32 %v544_v37, 0.0  ;;  %v773_v25 = vld [vmem:[%s1608_s5 + $0x8] sm:$0xff] }
  0xf4   : > { %v563_v49 = vpop.f32.mrf.mxu0 }
  0xf5   : > { %v564_v21 = vadd.f32 %v563_v49, %v413_v6  ;;  %v604_v33 = vmax.f32 %v562_v23, 0.0  ;;  %v597_v49 = vmax.f32 %v540_v39, 0.0 }
  0xf6   : > { %v567_v50 = vpop.f32.mrf.mxu0 }
  0xf7   : > { %v568_v18 = vadd.f32 %v567_v50, %v418_v2  ;;  %v605_v31 = vmax.f32 %v564_v21, 0.0  ;;  %v619_v50 = vld [vmem:[%s1606_s3 + $0x18] sm:$0xff] }
  0xf8   : > { %v569_v51 = vpop.f32.mrf.mxu0 }
  0xf9   : > { %v570_v16 = vadd.f32 %v569_v51, %v418_v2  ;;  %v606_v28 = vmax.f32 %v568_v18, 0.0  ;;  %v620_v51 = vld [vmem:[%s1606_s3 + $0x20] sm:$0xff] }
  0xfa   : > { %v573_v52 = vpop.f32.mrf.mxu0 }
  0xfb   : > { %v574_v13 = vadd.f32 %v573_v52, %v423_v61  ;;  %v607_v26 = vmax.f32 %v570_v16, 0.0 }
  0xfc   : > { %v575_v53 = vpop.f32.mrf.mxu0 }
  0xfd   : > { %v576_v11 = vadd.f32 %v575_v53, %v423_v61  ;;  %v608_v24 = vmax.f32 %v574_v13, 0.0  ;;  %v644_v61 = vpop.permute.xlu1 %643 }
  0xfe   : > { %v579_v55 = vpop.f32.mrf.mxu0 }
  0xff   : > { %v580_v9 = vadd.f32 %v579_v55, %v428_v56  ;;  %v609_v22 = vmax.f32 %v576_v11, 0.0 }
 0x100   : > { %v581_v57 = vpop.f32.mrf.mxu0 }
 0x101   : > { %v582_v7 = vadd.f32 %v581_v57, %v428_v56  ;;  %v610_v19 = vmax.f32 %v580_v9, 0.0 }
 0x102   : > { %v585_v58 = vpop.f32.mrf.mxu0 }
 0x103   : > { %v586_v5 = vadd.f32 %v585_v58, %v433_v59  ;;  %v611_v17 = vmax.f32 %v582_v7, 0.0  ;;  %v649_v58 = vpop.permute.xlu0 %648 }
 0x104   : > { %v587_v60 = vpop.f32.mrf.mxu0 }
 0x105   : > { %v588_v3 = vadd.f32 %v587_v60, %v433_v59  ;;  %v612_v14 = vmax.f32 %v586_v5, 0.0 }
 0x106   : > { %v591_v62 = vpop.f32.mrf.mxu0 }
 0x107   : > { %v592_v63 = vadd.f32 %v591_v62, %v438_v54  ;;  %v613_v12 = vmax.f32 %v588_v3, 0.0 }
 0x108   : > { %v593_v1 = vpop.f32.mrf.mxu0 }
 0x109   : > { %v594_v4 = vadd.f32 %v593_v1, %v438_v54  ;;  %v614_v10 = vmax.f32 %v592_v63, 0.0  ;;  %v639_v63 = vpop.permute.xlu0 %638 }
 0x10b   : > { %v615_v8 = vmax.f32 %v594_v4, 0.0 }
 0x10d   : > { %679 = vmatprep.subr.mxu1 %v615_v8  ;;  %v634_v8 = vpop.permute.xlu1 %633  ;;  %v629_v13 = vpop.permute.xlu0 %628 }
 0x10e   : > { %680 = vmatpush1.msra.mxu1 %v614_v10 }
 0x10f   : > { %681 = vmatprep.subr.mxu1 %v613_v12 }
 0x110   : > { %682 = vmatpush1.msra.mxu1 %v612_v14 }
 0x111   : > { %683 = vmatprep.subr.mxu1 %v611_v17  ;;  %v791_v30 = vpop.permute.xlu1 %790 }
 0x112   : > { %684 = vmatpush1.msra.mxu1 %v610_v19 }
 0x113   : > { %685 = vmatprep.subr.mxu1 %v609_v22 }
 0x114   : > { %686 = vmatpush1.msra.mxu1 %v608_v24  ;;  %v772_v24 = vld [vmem:[%s1608_s5] sm:$0xff] }
 0x115   : > { %687 = vmatprep.subr.mxu1 %v607_v26  ;;  %v774_v26 = vld [vmem:[%s1608_s5 + $0x10] sm:$0xf] }
 0x116   : > { %688 = vmatpush1.msra.mxu1 %v606_v28 }
 0x117   : > { %689 = vmatprep.subr.mxu1 %v605_v31 }
 0x118   : > { %690 = vmatpush1.msra.mxu1 %v604_v33  ;;  %v786_v33 = vpop.permute.xlu0 %785 }
 0x119   : > { %691 = vmatprep.subr.mxu1 %v603_v36 }
 0x11a   : > { %692 = vmatpush1.msra.mxu1 %v602_v38  ;;  %v781_v38 = vpop.permute.xlu1 %780 }
 0x11b   : > { %693 = vmatprep.subr.mxu1 %v601_v46 }
 0x11c   : > { %694 = vmatpush1.msra.mxu1 %v600_v47 }
 0x11d   : > { %695 = vmatprep.subr.mxu1 %v599_v44 }
 0x11e   : > { %696 = vmatpush1.msra.mxu1 %v598_v48 }
 0x11f   : > { %697 = vmatprep.subr.mxu1 %v597_v49 }
 0x120   : > { %698 = vmatpush1.msra.mxu1 %v596_v43 }
 0x121   : > { %1114 = vmatmul.mubr.msk.f32.vlgmr.msra.gmra.mxu1 %vm651_vm1, %v616_v42 }
 0x122   : > { %737 = vmatprep.mubr.f32.mxu1 %v1272_v0 }
 0x125   : > { %1115 = vmatmul.mubr.msk.f32.gmra.mxu1 %vm651_vm1, %v617_v40  ;;  %v892_v40 = vld [vmem:[%s1610_s7] sm:$0xff] }
 0x126   : > { %743 = vmatprep.mubr.f32.mxu1 %v1272_v0 }
 0x129   : > { %1116 = vmatmul.mubr.msk.f32.gmra.mxu1 %vm651_vm1, %v618_v41  ;;  %v893_v41 = vld [vmem:[%s1610_s7 + $0x8] sm:$0xff] }
 0x12a   : > { %749 = vmatprep.mubr.f32.mxu1 %v1272_v0 }
 0x12d   : > { %1117 = vmatmul.mubr.msk.f32.gmra.mxu1 %vm651_vm1, %v619_v50  ;;  %v899_v50 = vpop.permute.xlu0 %898 }
 0x12e   : > { %755 = vmatprep.mubr.f32.mxu1 %v1272_v0 }
 0x131   : > { %1118 = vmatmul.mubr.msk.f32.gmra.mxu1 %vm651_vm1, %v620_v51 }
 0x132   : > { %867 = vmatprep.mubr.f32.mxu1 %v1272_v0 }
 0x1e1   : > { %v733_v52 = vpop.f32.mrf.mxu1 }
 0x1e2   : > { %v734_v18 = vadd.f32 %v733_v52, %v629_v13 }
 0x1e3   : > { %v735_v53 = vpop.f32.mrf.mxu1 }
 0x1e4   : > { %v736_v16 = vadd.f32 %v735_v53, %v629_v13  ;;  %v762_v23 = vmax.f32 %v734_v18, 0.0 }
 0x1e5   : > { %v739_v54 = vpop.f32.mrf.mxu1 }
 0x1e6   : > { %v740_v14 = vadd.f32 %v739_v54, %v634_v8  ;;  %v763_v22 = vmax.f32 %v736_v16, 0.0 }
 0x1e7   : > { %v741_v55 = vpop.f32.mrf.mxu1 }
 0x1e8   : > { %v742_v11 = vadd.f32 %v741_v55, %v634_v8  ;;  %v764_v21 = vmax.f32 %v740_v14, 0.0  ;;  %v904_v55 = vpop.permute.xlu1 %903 }
 0x1e9   : > { %v745_v56 = vpop.f32.mrf.mxu1 }
 0x1ea   : > { %v746_v9 = vadd.f32 %v745_v56, %v639_v63  ;;  %v765_v20 = vmax.f32 %v742_v11, 0.0 }
 0x1eb   : > { %v747_v57 = vpop.f32.mrf.mxu1 }
 0x1ec   : > { %v748_v6 = vadd.f32 %v747_v57, %v639_v63  ;;  %v766_v19 = vmax.f32 %v746_v9, 0.0 }
 0x1ed   : > { %v751_v59 = vpop.f32.mrf.mxu1 }
 0x1ee   : > { %v752_v5 = vadd.f32 %v751_v59, %v644_v61  ;;  %v767_v17 = vmax.f32 %v748_v6, 0.0 }
 0x1ef   : > { %v753_v60 = vpop.f32.mrf.mxu1 }
 0x1f0   : > { %v754_v3 = vadd.f32 %v753_v60, %v644_v61  ;;  %v768_v15 = vmax.f32 %v752_v5, 0.0 }
 0x1f1   : > { %v757_v62 = vpop.f32.mrf.mxu1 }
 0x1f2   : > { %v758_v1 = vadd.f32 %v757_v62, %v649_v58  ;;  %v769_v12 = vmax.f32 %v754_v3, 0.0 }
 0x1f3   : > { %v759_v2 = vpop.f32.mrf.mxu1 }
 0x1f4   : > { %v760_v4 = vadd.f32 %v759_v2, %v649_v58  ;;  %v770_v10 = vmax.f32 %v758_v1, 0.0 }
 0x1f6   : > { %v771_v7 = vmax.f32 %v760_v4, 0.0 }
 0x1f8   : > { %825 = vmatprep.subr.mxu1 %v771_v7 }
 0x1f9   : > { %826 = vmatpush1.msra.mxu1 %v770_v10 }
 0x1fa   : > { %827 = vmatprep.subr.mxu1 %v769_v12 }
 0x1fb   : > { %828 = vmatpush1.msra.mxu1 %v768_v15 }
 0x1fc   : > { %829 = vmatprep.subr.mxu1 %v767_v17 }
 0x1fd   : > { %830 = vmatpush1.msra.mxu1 %v766_v19 }
 0x1fe   : > { %831 = vmatprep.subr.mxu1 %v765_v20 }
 0x1ff   : > { %832 = vmatpush1.msra.mxu1 %v764_v21 }
 0x200   : > { %833 = vmatprep.subr.mxu1 %v763_v22 }
 0x201   : > { %834 = vmatpush1.msra.mxu1 %v762_v23 }
 0x202   : > { %1119 = vmatmul.mubr.msk.f32.vlgmr.msra.gmra.mxu1 %vm793_vm2, %v772_v24 }
 0x203   : > { %873 = vmatprep.mubr.f32.mxu1 %v1272_v0 }
 0x206   : > { %1120 = vmatmul.mubr.msk.f32.gmra.mxu1 %vm793_vm2, %v773_v25 }
 0x207   : > { %879 = vmatprep.mubr.f32.mxu1 %v1272_v0 }
 0x20a   : > { %1121 = vmatmul.mubr.msk.f32.gmra.mxu1 %vm793_vm2, %v774_v26 }
 0x2c2   : > { %v869_v27 = vpop.f32.mrf.mxu1 }
 0x2c3   : > { %v870_v47 = vadd.f32 %v869_v27, %v781_v38 }
 0x2c4   : > { %v871_v28 = vpop.f32.mrf.mxu1 }
 0x2c5   : > { %v872_v46 = vadd.f32 %v871_v28, %v781_v38  ;;  %v886_v42 = vmax.f32 %v870_v47, 0.0 }
 0x2c6   : > { %v875_v29 = vpop.f32.mrf.mxu1 }
 0x2c7   : > { %v876_v39 = vadd.f32 %v875_v29, %v786_v33  ;;  %v887_v43 = vmax.f32 %v872_v46, 0.0 }
 0x2c8   : > { %v877_v31 = vpop.f32.mrf.mxu1 }
 0x2c9   : > { %v878_v36 = vadd.f32 %v877_v31, %v786_v33  ;;  %v888_v49 = vmax.f32 %v876_v39, 0.0 }
 0x2ca   : > { %v881_v32 = vpop.f32.mrf.mxu1 }
 0x2cb   : > { %v882_v34 = vadd.f32 %v881_v32, %v791_v30  ;;  %v889_v48 = vmax.f32 %v878_v36, 0.0 }
 0x2cc   : > { %v883_v35 = vpop.f32.mrf.mxu1 }
 0x2cd   : > { %v884_v37 = vadd.f32 %v883_v35, %v791_v30  ;;  %v890_v44 = vmax.f32 %v882_v34, 0.0 }
 0x2cf   : > { %v891_v45 = vmax.f32 %v884_v37, 0.0 }
 0x2d1   : > { %1122 = vmatprep.subr.msk.mxu0 %vm913_vm3, %v891_v45 }
 0x2d2   : > { %1123 = vmatpush1.msk.msra.mxu0 %vm913_vm3, %v890_v44 }
 0x2d3   : > { %948 = vmatprep.subr.mxu0 %v889_v48 }
 0x2d4   : > { %949 = vmatpush1.msra.mxu0 %v888_v49 }
 0x2d5   : > { %950 = vmatprep.subr.mxu0 %v887_v43 }
 0x2d6   : > { %951 = vmatpush1.msra.mxu0 %v886_v42 }
 0x2d7   : > { %1124 = vmatmul.mubr.msk.f32.vlgmr.msra.gmra.mxu0 %vm906_vm4, %v892_v40 }
 0x2d8   : > { %990 = vmatprep.mubr.f32.mxu0 %v1272_v0 }
 0x2db   : > { %1125 = vmatmul.mubr.msk.f32.gmra.mxu0 %vm906_vm4, %v893_v41 }
 0x397   : > { %v986_v51 = vpop.f32.mrf.mxu0 }
 0x398   : > { %v987_v52 = vadd.f32 %v986_v51, %v899_v50 }
 0x399   : > { %v988_v53 = vpop.f32.mrf.mxu0 }
 0x39a   : > { %997 = vst [vmem:[%s350_s15] sm:$0xff] %v987_v52  ;;  %v989_v54 = vadd.f32 %v988_v53, %v899_v50 }
 0x39b   : > { %v992_v56 = vpop.f32.mrf.mxu0 }
 0x39c   : > { %998 = vst [vmem:[%s350_s15 + $0x8] sm:$0xff] %v989_v54  ;;  %v993_v0 = vadd.f32 %v992_v56, %v904_v55 }
 0x39d   : > { %v994_v57 = vpop.f32.mrf.mxu0 }
 0x39e   : > { %999 = vst [vmem:[%s350_s15 + $0x10] sm:$0xff] %v993_v0  ;;  %v995_v58 = vadd.f32 %v994_v57, %v904_v55 }
 0x3a0   : > { %1000 = vst [vmem:[%s350_s15 + $0x18] sm:$0xff] %v995_v58 }
 0x3a1   : > { %1207 = shalt.err (!%p1204_p5)
}
 0x3a2   : > { %s1208_s27 = scalar_lea.hbm %s1556_s24, 512  ;;  %s1212_s15 = scalar_lea.hbm %s1612_s9, 1024 }
 0x3a3   : > { %p1209_p6 = scmp.ne.s32.totalorder %s1556_s24, %s1208_s27  ;;  %p1213_p10 = scmp.lt.s32.totalorder %s1556_s24, %s1612_s9 }
 0x3a4   : > { %p1214_p11 = scmp.lt.s32.totalorder %s1212_s15, %s1208_s27 }
 0x3a5   : > { %p1210_p7 = pnand %p1209_p6, %p1367_p4 }
 0x3a6   : > { %p1215_p12 = por %p1214_p11, %p1213_p10 }
 0x3a7   : > { %p1211_p9 = pneg %p1210_p7 }
 0x3a9   : > { %p1216_p13 = pnand %p1215_p12, %p1211_p9 }
 0x3ab   : > { %1219 = shalt.err (!%p1216_p13)
}
 0x3ac   : > { %s1275_s23 = smov 256   ;;  %s1276_s12 = smov 16  }
 0x3ad   : > { %1133 = dma.vmem_to_hbm [thread:$0]  (%p1367_p4), %s1551_s16, 512, %s1556_s24, %s1558_s25, %s1275_s23, %s1275_s23, %s1276_s12  }
 0x3ae PF: > { %p1139_p0 = scmp.ge.s32.totalorder %s1270_s14, 2  ;;  %s1032_s13 = sand.u32 1, %s1250_s30  }
 0x3af   : > { %s1033_s17 = scalar_lea.sflag [#allocation3], %s1032_s13 }
 0x3b0   : > { %p1136_p1 = pnand %p1139_p0, %p1374_p8 }
 0x3b2   : > { %p1137_p2 = pneg %p1136_p1 }
 0x3b4   : > { %1245 = dma.done.wait (%p1137_p2), %s1033_s17, 512  }
 0x3b5   : > { %1247 = vsyncadd (%p1137_p2), %s1033_s17, 4294966784  ;;  %s22_s14 = sadd.s32 1, %s1270_s14   ;;  %s1619_s12 = sld [smem:[#allocation5_spill]] }
 0x3b6   : > { %p19_p3 = scmp.ge.s32.totalorder %s22_s14, 4   ;;  %s1620_s13 = sld [smem:[#allocation6_spill]] }
 0x3b7   : > { %s1621_s30 = smov %s1254_s10  ;;  %s1622_s10 = smov %s1258_s11 }
 0x3b8   : > { %s1623_s11 = smov %s1380_s22  ;;  %21 = sbr.rel (!%p19_p3) target bundleno = 4 (0x4), region = 91 }
 0x3bd   :  { %1038 = vsyncpa [#allocation3], 1 }
 0x3be   :  { %1040 = vsyncpa [#allocation3 + $0x1], 1 }

</bundles_post_ra>
